<compile_context>
chip_gen: v6e
topology: v6e:2x2x1
jax: 0.10.0
libtpu: 0.0.40
codegen_flags: <defaults>
</compile_context>

<pallas_src>
import functools
import math

import numpy as np

import jax
import jax.numpy as jnp
from jax import lax
from jax.experimental import pallas as pl
from jax.experimental.pallas import tpu as pltpu


# --------------------------------------------------------------------------
# Host-side helpers
# --------------------------------------------------------------------------
def _lcm(a, b):
    return a * b // math.gcd(a, b)


def _round_up(x, m):
    return ((x + m - 1) // m) * m


def _band_matrix(scale, w_in, w_out, off_in, off_out, pad, ksize, weight):
    """Fused (nearest-stretch + uniform conv) band matrix for one layer.

    Maps an input window whose column p has absolute position p + off_in
    (times the tile base) to an output window whose column q has absolute
    position q + off_out.  M[p, q] = weight * |conv_window(q) n stretch_block(p)|.
    Rows for input columns outside the dependency cone are exactly zero.
    """
    p = np.arange(w_in)[:, None]
    q = np.arange(w_out)[None, :]
    blk_lo = (p + off_in) * scale
    blk_hi = blk_lo + scale - 1
    win_lo = q + off_out - pad
    win_hi = win_lo + ksize - 1
    count = np.maximum(np.minimum(win_hi, blk_hi) - np.maximum(win_lo, blk_lo) + 1, 0)
    return jnp.asarray(count.astype(np.float32) * weight)


# --------------------------------------------------------------------------
# Kernel body: one (row-block, final-output-time-tile) step of the cascade.
# --------------------------------------------------------------------------
def _fused_cascade_kernel(x_ref, *refs, layer_meta, last_chunk, activation,
                          negative_slope):
    o_ref = refs[-1]
    m_refs = refs[:-1]
    tj = pl.program_id(1)

    def act(y):
        if activation == "relu":
            return jnp.maximum(y, 0.0)
        if activation == "leaky_relu":
            return jnp.where(y >= 0.0, y, negative_slope * y)
        return y

    z = x_ref[...].astype(jnp.float32)                        # (br, W0)
    n_layers = len(layer_meta)
    for l in range(n_layers):
        w_out, tc_l, off_l, t_true = layer_meta[l]
        m = m_refs[l][...]                                    # VMEM-resident band
        is_last = l == n_layers - 1
        if is_last and last_chunk is not None:
            # Block-banded final layer: identical sub-matrix per 128*k lane chunk.
            chunk_out, chunk_in, chunk_stride = last_chunk
            for c in range(w_out // chunk_out):
                xin = z[:, c * chunk_stride:c * chunk_stride + chunk_in]
                y = act(jnp.dot(xin, m, preferred_element_type=jnp.float32))
                o_ref[:, c * chunk_out:(c + 1) * chunk_out] = y.astype(o_ref.dtype)
        else:
            z = act(jnp.dot(z, m, preferred_element_type=jnp.float32))
            if is_last:
                o_ref[...] = z.astype(o_ref.dtype)
            else:
                # Zero the window columns outside the true signal range so the
                # next layer sees exact conv zero-padding at both boundaries.
                pos = (lax.broadcasted_iota(jnp.int32, (1, w_out), 1)
                       + (tj * tc_l + off_l))
                valid = jnp.logical_and(pos >= 0, pos < t_true)
                z = jnp.where(valid, z, 0.0)


# --------------------------------------------------------------------------
# Wrapper: full UpsampleNetwork forward pass in one pallas_call.
# --------------------------------------------------------------------------
def upsample_network(c, upsample_scales, *, nonlinear_activation=None,
                     nonlinear_activation_params=None,
                     interpolate_mode="nearest", freq_axis_kernel_size=1,
                     use_causal_conv=False, max_tile_lanes=1024,
                     max_rows_per_block=256):
    """Forward pass of UpsampleNetwork. c: (B, C, T) -> (B, C, T*prod(scales))."""
    assert interpolate_mode == "nearest"
    assert freq_axis_kernel_size == 1
    # TODO(synk): freq_axis_kernel_size > 1 mixes adjacent mel bins (needs a
    # freq-axis halo across rows of the same batch element); not implemented.

    activation, negative_slope = None, 0.01
    params = nonlinear_activation_params or {}
    if nonlinear_activation is not None:
        if nonlinear_activation == "ReLU":
            activation = "relu"
        elif nonlinear_activation == "LeakyReLU":
            activation = "leaky_relu"
            negative_slope = float(params.get("negative_slope", 0.01))
        else:
            raise NotImplementedError(nonlinear_activation)

    scales = [int(s) for s in upsample_scales]
    n_layers = len(scales)
    assert n_layers >= 1
    b, ch, t0 = c.shape
    total = int(np.prod(scales))
    t_out = t0 * total
    r = b * ch
    x = c.reshape(r, t0)                      # rows = B*C (independent rows)
    dtype = x.dtype
    itemsize = jnp.dtype(dtype).itemsize

    hl = 2 if use_causal_conv else 1          # per-layer input halo (left, right)
    hr = 2 - hl

    # ---- final-output time tile: multiple of lcm(total, 128) (lane-dense and
    #      alignment-preserving), <= max_tile_lanes when possible, and chosen so
    #      the time grid axis has >= 2 steps (megacore on v7x).
    unit = _lcm(total, 128)
    t_out_units = pl.cdiv(t_out, unit)
    tiles_per_step = max(1, min(max(1, max_tile_lanes // unit),
                                pl.cdiv(t_out_units, 2)))
    tc = tiles_per_step * unit
    tc0 = tc // total
    t0_pad = pl.cdiv(t0, tc0) * tc0
    nt = t0_pad // tc0
    t_out_pad = nt * tc

    # per-layer columns-per-final-tile and true (unpadded) signal lengths
    tc_l = [tc0]
    t_true = [t0]
    for s in scales:
        tc_l.append(tc_l[-1] * s)
        t_true.append(t_true[-1] * s)

    # ---- backward window recursion: the layer-l window needed for one final
    #      tile is [off[l], off[l]+win[l]-1] relative to tj * tc_l[l].
    off = [0] * (n_layers + 1)
    win = [0] * (n_layers + 1)
    off[n_layers], win[n_layers] = 0, tc
    for l in range(n_layers, 0, -1):
        s = scales[l - 1]
        lo = off[l] // s - hl                       # python // is floor (neg ok)
        hi = (off[l] + win[l] - 1) // s + hr
        off[l - 1] = lo
        win[l - 1] = _round_up(hi - lo + 1, 8)      # 8-aligned K dims (free)

    # ---- block-banded final layer: one shared sub-matrix per lcm(s,128)-lane
    #      output chunk (chunk/s + 2 input columns instead of the full window).
    s_last = scales[-1]
    chunk_out = _lcm(s_last, 128)
    if chunk_out < tc:
        chunk_stride = chunk_out // s_last
        chunk_in = chunk_stride + hl + hr
        last_chunk = (chunk_out, chunk_in, chunk_stride)
    else:
        last_chunk = None

    # ---- per-layer fused (stretch + uniform conv) band matrices (constants)
    mats = []
    for l in range(1, n_layers + 1):
        s = scales[l - 1]
        ksize = 2 * s + 1
        w = 1.0 / float(ksize)                      # deterministic Conv2d init
        pad = 2 * s if use_causal_conv else s
        if l == n_layers and last_chunk is not None:
            mats.append(_band_matrix(s, last_chunk[1], last_chunk[0],
                                     off[l - 1], 0, pad, ksize, w))
        else:
            mats.append(_band_matrix(s, win[l - 1], win[l],
                                     off[l - 1], off[l], pad, ksize, w))

    # ---- row blocking: pack all B*C rows (padded to x8), cap per block
    r8 = _round_up(r, 8)
    if r8 <= max_rows_per_block:
        br, r_pad = r8, r8
    else:
        br = max_rows_per_block
        r_pad = pl.cdiv(r, br) * br
    nr = r_pad // br

    # ---- zero-pad the (small) input and materialize overlapping input windows
    #      (nt, r_pad, win[0]).  Only the raw input (~1/total of the output) is
    #      duplicated; every intermediate stays in VMEM inside the kernel.
    left = -off[0]
    width = (nt - 1) * tc0 + win[0]
    x_p = jnp.pad(x, ((0, r_pad - r), (left, width - left - t0)))
    col_idx = jnp.arange(nt)[:, None] * tc0 + jnp.arange(win[0])[None, :]
    x_tiles = jnp.transpose(jnp.take(x_p, col_idx, axis=1), (1, 0, 2))

    kernel = functools.partial(
        _fused_cascade_kernel,
        layer_meta=tuple((win[l], tc_l[l], off[l], t_true[l])
                         for l in range(1, n_layers + 1)),
        last_chunk=last_chunk,
        activation=activation,
        negative_slope=negative_slope)

    per_row = 0
    for l in range(1, n_layers + 1):
        if l == n_layers and last_chunk is not None:
            per_row += 2 * (tc // last_chunk[0]) * last_chunk[1] * last_chunk[0]
        else:
            per_row += 2 * win[l - 1] * win[l]
    cost = pl.CostEstimate(
        flops=int(r_pad * nt * per_row),
        transcendentals=0,
        bytes_accessed=int(x_tiles.size * itemsize
                           + sum(int(m.size) * 4 for m in mats)
                           + r_pad * t_out_pad * itemsize))

    in_specs = [pl.BlockSpec((pl.Squeezed(), br, win[0]),
                             lambda ri, tj: (tj, ri, 0))]
    for m in mats:
        # Constant index_map -> each band matrix is DMA'd once per row-block and
        # stays VMEM-resident.  (pipeline_mode=pl.Buffered(1) would also drop
        # the unused second pipeline buffer; left at default for portability.)
        in_specs.append(pl.BlockSpec(m.shape, lambda ri, tj: (0, 0)))

    out = pl.pallas_call(
        kernel,
        out_shape=jax.ShapeDtypeStruct((r_pad, t_out_pad), dtype),
        grid=(nr, nt),
        in_specs=in_specs,
        out_specs=pl.BlockSpec((br, tc), lambda ri, tj: (ri, tj)),
        compiler_params=pltpu.CompilerParams(
            dimension_semantics=("parallel", "parallel")),
        cost_estimate=cost,
    )(x_tiles, *mats)

    return out[:r, :t_out].reshape(b, ch, t_out)


# --------------------------------------------------------------------------
# Pure-JAX reference mirroring the PyTorch module exactly.
# --------------------------------------------------------------------------
def _reference(c, upsample_scales, *, nonlinear_activation=None,
               nonlinear_activation_params=None, use_causal_conv=False):
    params = nonlinear_activation_params or {}
    x = c[:, None, :, :]                                    # (B, 1, C, T)
    for s in upsample_scales:
        x = jnp.repeat(x, s, axis=-1)                       # Stretch2d (nearest)
        k = 2 * s + 1
        w = jnp.full((1, 1, 1, k), 1.0 / k, jnp.float32)    # Conv2d const init
        pad = (2 * s, 2 * s) if use_causal_conv else (s, s)
        y = lax.conv_general_dilated(
            x.astype(jnp.float32), w, window_strides=(1, 1),
            padding=((0, 0), pad),
            dimension_numbers=("NCHW", "OIHW", "NCHW"))
        x = y[..., : x.shape[-1]] if use_causal_conv else y
        if nonlinear_activation == "ReLU":
            x = jnp.maximum(x, 0.0)
        elif nonlinear_activation == "LeakyReLU":
            ns = params.get("negative_slope", 0.01)
            x = jnp.where(x >= 0.0, x, ns * x)
    return x[:, 0]


if __name__ == "__main__":
    # ---- 1) small smoke test (single-tile path, no activation) ----------
    B, C, T = 2, 4, 8
    scales = [4, 4]                                          # T' = 8 * 16 = 128
    c = jax.random.normal(jax.random.PRNGKey(0), (B, C, T), dtype=jnp.float32)
    out = jax.block_until_ready(upsample_network(c, scales))
    assert out.shape == (B, C, T * 16), out.shape
    ref = _reference(c, scales)
    err = float(jnp.max(jnp.abs(out - ref)))
    assert err < 1e-4, f"base max abs error {err}"

    # ---- 2) fused 3-layer cascade: banded last layer, 2 time tiles,
    #         boundary masking, LeakyReLU with params ----------------------
    B2, C2, T2 = 2, 40, 50
    scales2 = [4, 4, 2]                                      # T' = 50 * 32 = 1600
    act_params = {"negative_slope": 0.2}
    c2 = jax.random.normal(jax.random.PRNGKey(1), (B2, C2, T2), dtype=jnp.float32)
    out2 = jax.block_until_ready(
        upsample_network(c2, scales2, nonlinear_activation="LeakyReLU",
                         nonlinear_activation_params=act_params))
    assert out2.shape == (B2, C2, T2 * 32), out2.shape
    ref2 = _reference(c2, scales2, nonlinear_activation="LeakyReLU",
                      nonlinear_activation_params=act_params)
    err2 = float(jnp.max(jnp.abs(out2 - ref2)))
    assert err2 < 1e-4, f"fused/leaky max abs error {err2}"

    # ---- 3) causal conv + ReLU ------------------------------------------
    B3, C3, T3 = 2, 4, 16
    scales3 = [4, 2]                                         # T' = 16 * 8 = 128
    c3 = jax.random.normal(jax.random.PRNGKey(2), (B3, C3, T3), dtype=jnp.float32)
    out3 = jax.block_until_ready(
        upsample_network(c3, scales3, nonlinear_activation="ReLU",
                         use_causal_conv=True))
    assert out3.shape == (B3, C3, T3 * 8), out3.shape
    ref3 = _reference(c3, scales3, nonlinear_activation="ReLU",
                      use_causal_conv=True)
    err3 = float(jnp.max(jnp.abs(out3 - ref3)))
    assert err3 < 1e-4, f"causal/relu max abs error {err3}"

    # ---- 4) multi row-block + many small tiles (exercises nr>1, nt>2) ---
    out4 = jax.block_until_ready(
        upsample_network(c2, scales2, nonlinear_activation="LeakyReLU",
                         nonlinear_activation_params=act_params,
                         max_tile_lanes=256, max_rows_per_block=32))
    err4 = float(jnp.max(jnp.abs(out4 - ref2)))
    assert err4 < 1e-4, f"small-tile/multi-row-block max abs error {err4}"

    print("KERNEL_OK")
</pallas_src>

<mosaic_0001>
module attributes {stable_mosaic.version = 11 : i64} {
  func.func @_fused_cascade_kernel(%arg0: i32, %arg1: i32, %arg2: memref<1x8x16xf32, #tpu.memory_space<vmem>>, %arg3: memref<16x40xf32, #tpu.memory_space<vmem>>, %arg4: memref<40x128xf32, #tpu.memory_space<vmem>>, %arg5: memref<8x128xf32, #tpu.memory_space<vmem>>) attributes {dimension_semantics = [#tpu.dimension_semantics<parallel>, #tpu.dimension_semantics<parallel>], iteration_bounds = array<i64: 1, 1>, scalar_prefetch = 0 : i64, scratch_operands = 0 : i64, tpu.core_type = #tpu.core_type<tc>, window_params = [{transform_indices = @transform_0, window_bounds = array<i64: 1, 8, 16>}, {pipeline_mode = #tpu.pipeline_mode<synchronous>, transform_indices = @transform_1, window_bounds = array<i64: 16, 40>}, {pipeline_mode = #tpu.pipeline_mode<synchronous>, transform_indices = @transform_2, window_bounds = array<i64: 40, 128>}, {transform_indices = @transform_3, window_bounds = array<i64: 8, 128>}]} {
    %c0 = arith.constant 0 : index
    %c0_0 = arith.constant 0 : index
    %c0_1 = arith.constant 0 : index
    %0 = vector.load %arg2[%c0, %c0_0, %c0_1] : memref<1x8x16xf32, #tpu.memory_space<vmem>>, vector<1x8x16xf32>
    %1 = vector.shape_cast %0 : vector<1x8x16xf32> to vector<8x16xf32>
    %c0_2 = arith.constant 0 : index
    %c0_3 = arith.constant 0 : index
    %2 = vector.load %arg3[%c0_2, %c0_3] : memref<16x40xf32, #tpu.memory_space<vmem>>, vector<16x40xf32>
    %cst = arith.constant dense<0.000000e+00> : vector<8x40xf32>
    %3 = tpu.matmul %1, %2, %cst {dimension_numbers = #tpu.dot_dimension_numbers<[1], [0], [0], [1], [0, 0, 1, 1], [], []>} : vector<8x16xf32>, vector<16x40xf32>, vector<8x40xf32> -> vector<8x40xf32>
    %4 = tpu.iota {dimensions = array<i32: 1>} : vector<1x40xi32>
    %c32_i32 = arith.constant 32 : i32
    %5 = arith.muli %arg1, %c32_i32 : i32
    %c-1_i32 = arith.constant -1 : i32
    %6 = arith.addi %5, %c-1_i32 : i32
    %7 = vector.broadcast %6 : i32 to vector<1x40xi32>
    %8 = arith.addi %4, %7 : vector<1x40xi32>
    %c0_i32 = arith.constant 0 : i32
    %9 = vector.broadcast %c0_i32 : i32 to vector<1x40xi32>
    %10 = arith.cmpi sge, %8, %9 : vector<1x40xi32>
    %c32_i32_4 = arith.constant 32 : i32
    %11 = vector.broadcast %c32_i32_4 : i32 to vector<1x40xi32>
    %12 = arith.cmpi slt, %8, %11 : vector<1x40xi32>
    %13 = arith.andi %10, %12 : vector<1x40xi1>
    %cst_5 = arith.constant 0.000000e+00 : f32
    %14 = vector.shape_cast %13 : vector<1x40xi1> to vector<1x40xi1>
    %15 = vector.broadcast %14 : vector<1x40xi1> to vector<8x40xi1>
    %16 = vector.broadcast %cst_5 : f32 to vector<8x40xf32>
    %17 = arith.select %15, %3, %16 : vector<8x40xi1>, vector<8x40xf32>
    %c0_6 = arith.constant 0 : index
    %c0_7 = arith.constant 0 : index
    %18 = vector.load %arg4[%c0_6, %c0_7] : memref<40x128xf32, #tpu.memory_space<vmem>>, vector<40x128xf32>
    %cst_8 = arith.constant dense<0.000000e+00> : vector<8x128xf32>
    %19 = tpu.matmul %17, %18, %cst_8 {dimension_numbers = #tpu.dot_dimension_numbers<[1], [0], [0], [1], [0, 0, 1, 1], [], []>} : vector<8x40xf32>, vector<40x128xf32>, vector<8x128xf32> -> vector<8x128xf32>
    %c0_9 = arith.constant 0 : index
    %c0_10 = arith.constant 0 : index
    %20 = vector.load %arg5[%c0_9, %c0_10] : memref<8x128xf32, #tpu.memory_space<vmem>>, vector<8x128xf32>
    tpu.vector_store %arg5[%c0_9, %c0_10], %19 {strides = array<i32>} : memref<8x128xf32, #tpu.memory_space<vmem>>, vector<8x128xf32>,
    return
  }
  func.func @transform_0(%arg0: i32, %arg1: i32) -> (i32, i32, i32) {
    %c0_i32 = arith.constant 0 : i32
    %c0_i32_0 = arith.constant 0 : i32
    return %arg1, %arg0, %c0_i32 : i32, i32, i32
  }
  func.func @transform_1(%arg0: i32, %arg1: i32) -> (i32, i32) {
    %c0_i32 = arith.constant 0 : i32
    %c0_i32_0 = arith.constant 0 : i32
    %c0_i32_1 = arith.constant 0 : i32
    return %c0_i32, %c0_i32_0 : i32, i32
  }
  func.func @transform_2(%arg0: i32, %arg1: i32) -> (i32, i32) {
    %c0_i32 = arith.constant 0 : i32
    %c0_i32_0 = arith.constant 0 : i32
    %c0_i32_1 = arith.constant 0 : i32
    return %c0_i32, %c0_i32_0 : i32, i32
  }
  func.func @transform_3(%arg0: i32, %arg1: i32) -> (i32, i32) {
    %c0_i32 = arith.constant 0 : i32
    return %arg0, %arg1 : i32, i32
  }
}

</mosaic_0001>

<bundles_post_ra>
// kernel: tpu_custom_call.1
= control target key start
LH: loop header
LB: loop body
LE: loop exit
PB: predicated region body
PF: predicated region fallthrough
CT: control target
= control target key end

     0   :  { %8 = vsyncpa [#allocation3], 0  ;;  %s404_s0 = inlined_call_operand.hbm [shape: f32[1,8,16], index: 0, kind: input, shape index: {}]   ;;  %s405_s1 = inlined_call_operand.hbm [shape: f32[16,40], index: 1, kind: input, shape index: {}]   ;;  %s406_s2 = inlined_call_operand.hbm [shape: f32[40,128], index: 2, kind: input, shape index: {}]   ;;  %s407_s3 = inlined_call_operand.hbm [shape: f32[8,128], index: 3, kind: output, shape index: {}]  }
   0x1   :  { %9 = vsyncpa [#allocation6], 0 }
   0x2   :  { %10 = vsyncpa [#allocation4], 0  ;;  %s364_s12 = smov [#allocation5]  }
   0x3   :  { %s26_s13 = sshll.u32 %s364_s12, 4  ;;  %s27_s13 = int_to_ptr.vmem [resolvable:$true] %s26_s13 }
   0x4   :  { %s286_s14 = scalar_lea.vmem %s27_s13, 256  ;;  %p291_p1 = scmp.lt.s32.totalorder %s27_s13, %s27_s13 }
   0x5   :  { %p287_p0 = scmp.ne.s32.totalorder %s27_s13, %s286_s14  ;;  %p292_p2 = scmp.lt.s32.totalorder %s286_s14, %s286_s14 }
   0x7   :  { %p293_p3 = por %p292_p2, %p291_p1 }
   0x9   :  { %p294_p4 = pnand %p293_p3, %p287_p0 }
   0xb   :  { %297 = shalt.err (!%p294_p4)
}
   0xc   :  { %s365_s15 = smov 128   ;;  %s366_s16 = smov 8  }
   0xd   :  { %32 = dma.hbm_to_vmem [thread:$0]  %s405_s1, 256, %s27_s13, [#allocation6], %s365_s15, %s365_s15, %s366_s16  }
   0xe   :  { %s367_s19 = smov [#allocation2]   ;;  %s368_s21 = smov [#allocation7]  }
   0xf   :  { %s17_s20 = sshll.u32 %s367_s19, 4  ;;  %s38_s22 = sshll.u32 %s368_s21, 4  ;;  %s18_s20 = int_to_ptr.vmem [resolvable:$true] %s17_s20  ;;  %s39_s22 = int_to_ptr.vmem [resolvable:$true] %s38_s22 }
  0x10   :  { %s306_s23 = scalar_lea.vmem %s18_s20, 128  ;;  %p311_p6 = scmp.lt.s32.totalorder %s18_s20, %s18_s20 }
  0x11   :  { %p307_p5 = scmp.ne.s32.totalorder %s18_s20, %s306_s23  ;;  %p312_p7 = scmp.lt.s32.totalorder %s306_s23, %s306_s23 }
  0x13   :  { %p313_p8 = por %p312_p7, %p311_p6 }
  0x15   :  { %p314_p9 = pnand %p313_p8, %p307_p5 }
  0x17   :  { %317 = shalt.err (!%p314_p9)
}
  0x18   :  { %20 = dma.hbm_to_vmem [thread:$0]  %s404_s0, 128, %s18_s20, [#allocation3]  }
  0x19   :  { %s326_s26 = scalar_lea.vmem %s39_s22, 640  ;;  %p331_p11 = scmp.lt.s32.totalorder %s39_s22, %s39_s22 }
  0x1a   :  { %p327_p10 = scmp.ne.s32.totalorder %s39_s22, %s326_s26  ;;  %p332_p12 = scmp.lt.s32.totalorder %s326_s26, %s326_s26 }
  0x1c   :  { %p333_p13 = por %p332_p12, %p331_p11 }
  0x1e   :  { %p334_p0 = pnand %p333_p13, %p327_p10 }
  0x20   :  { %337 = shalt.err (!%p334_p0)
}
  0x21   :  { %44 = dma.hbm_to_vmem [thread:$0]  %s406_s2, 640, %s39_s22, [#allocation6], %s365_s15, %s365_s15, %s366_s16  }
  0x22   :  { %358 = dma.done.wait [#allocation3], 128  }
  0x23   :  { %359 = vsyncadd [#allocation3], 4294967168 }
  0x24   :  { %360 = dma.done.wait [#allocation6], 896  }
  0x25   :  { %361 = vsyncadd [#allocation6], 4294966400  ;;  %v369_v0 = vmov 0.0   ;;  %vm370_vm0 = vmmov 0   ;;  %v56_v1 = vld [vmem:[#allocation5 + $0x8] sm:$0xff]  ;;  %v55_v2 = vld [vmem:[#allocation5] sm:$0xff]  ;;  %v131_v9 = vlaneseq }
  0x26   :  { %250 = vmatprep.subr.mxu0 %v369_v0  ;;  %254 = vmatprep.mubr.msk.f32.mxu0 %vm370_vm0, %v369_v0  ;;  %v54_v3 = vld [vmem:[#allocation2] sm:$0xff]  ;;  %vm57_vm1 = vcmask 130048   ;;  %v147_v4 = vld [vmem:[#allocation7 + $0x20] sm:$0xff]  ;;  %v146_v5 = vld [vmem:[#allocation7 + $0x18] sm:$0xff]  ;;  %vm148_vm5 = vcmask 326656   ;;  %s371_s0 = smov [#allocation8]  }
  0x27   :  { %257 = vmatprep.subr.mxu1 %v369_v0  ;;  %267 = vmatprep.mubr.msk.f32.mxu1 %vm370_vm0, %v369_v0  ;;  %v145_v6 = vld [vmem:[#allocation7 + $0x10] sm:$0xff]  ;;  %v144_v7 = vld [vmem:[#allocation7 + $0x8] sm:$0xff]  ;;  %v143_v8 = vld [vmem:[#allocation7] sm:$0xff]  ;;  %v132_v10 = vand.u32 127, %v131_v9  ;;  %s229_s2 = sshll.u32 %s371_s0, 4  ;;  %s230_s2 = int_to_ptr.vmem [resolvable:$true] %s229_s2 }
  0x28   :  { %251 = vmatpush3.msra.mxu0 %v56_v1  ;;  %258 = vmatpush3.msra.mxu1 %v147_v4  ;;  %s338_s28 = scalar_lea.vmem %s230_s2, 128  ;;  %p343_p2 = scmp.lt.s32.totalorder %s230_s2, %s230_s2 }
  0x29   :  { %252 = vmatprep.subr.mxu0 %v369_v0  ;;  %259 = vmatprep.subr.mxu1 %v369_v0  ;;  %v136_v11 = vadd.s32 4294967295, %v132_v10  ;;  %p339_p1 = scmp.ne.s32.totalorder %s230_s2, %s338_s28  ;;  %p344_p3 = scmp.lt.s32.totalorder %s338_s28, %s338_s28 }
  0x2a   :  { %253 = vmatpush3.msra.mxu0 %v55_v2  ;;  %260 = vmatpush3.msra.mxu1 %v146_v5 }
  0x2b   :  { %255 = vmatmul.mubr.msk.f32.vlgmr.msra.gmra.mxu0 %vm57_vm1, %v54_v3  ;;  %261 = vmatprep.subr.mxu1 %v369_v0  ;;  %vm137_vm2 = vcmp.ge.s32.totalorder %v136_v11, 0  ;;  %vm138_vm3 = vcmp.lt.s32.totalorder %v136_v11, 32  ;;  %p345_p4 = por %p344_p3, %p343_p2 }
  0x2c   :  { %262 = vmatpush3.msra.mxu1 %v145_v6  ;;  %vm139_vm4 = vmand %vm137_vm2, %vm138_vm3 }
  0x2d   :  { %263 = vmatprep.subr.mxu1 %v369_v0  ;;  %p346_p5 = pnand %p345_p4, %p339_p1 }
  0x2e   :  { %264 = vmatpush3.msra.mxu1 %v144_v7 }
  0x2f   :  { %265 = vmatprep.subr.mxu1 %v369_v0 }
  0x30   :  { %266 = vmatpush3.msra.mxu1 %v143_v8 }
  0xeb   :  { %v127_v12 = vpop.f32.mrf.mxu0 }
  0xec   :  { %v142_v13 = vsel %vm139_vm4, %v127_v12, 0.0 }
  0xed   :  { %v256_v14 = vpop.f32.mrf.mxu0  ;;  %268 = vmatmul.mubr.msk.f32.vlgmr.msra.gmra.mxu1 %vm148_vm5, %v142_v13 }
 0x1ad   :  { %v218_v15 = vpop.f32.mrf.mxu1 }
 0x1ae   :  { %222 = vst [vmem:[#allocation8] sm:$0xff] %v218_v15 }
 0x1af   :  { %v269_v16 = vpop.f32.mrf.mxu1 }
 0x1b0   :  { %349 = shalt.err (!%p346_p5)
}
 0x1b1   :  { %232 = dma.vmem_to_hbm [thread:$0]  %s230_s2, 128, %s407_s3, [#allocation4]  }
 0x1b2   :  { %362 = dma.done.wait [#allocation4], 128  }
 0x1b3   :  { %363 = vsyncadd [#allocation4], 4294967168 }
 0x1b4   :  { %236 = vsyncpa [#allocation3], 1 }
 0x1b5   :  { %237 = vsyncpa [#allocation6], 1 }
 0x1b6   :  { %238 = vsyncpa [#allocation4], 1 }

</bundles_post_ra>
